<compile_context>
chip_gen: v5e
topology: v5e:2x2
jax: 0.10.0
libtpu: 0.0.40
codegen_flags: <defaults>
</compile_context>

<pallas_src>
import jax
import jax.numpy as jnp
from jax.experimental import pallas as pl
from jax.experimental.pallas import tpu as pltpu

EPSILON = 0.002  # matches `epsilon` in the reference script


def _softplus(x):
    # Numerically stable softplus matching torch.nn.Softplus(beta=1):
    #   softplus(x) = max(x, 0) + log(1 + exp(-|x|))
    return jnp.maximum(x, 0.0) + jnp.log(1.0 + jnp.exp(-jnp.abs(x)))


def _kinetic_mlp_kernel(qT_ref,
                        w1_ref, b1_ref,
                        w2_ref, b2_ref,
                        w3_ref, b3_ref,
                        outT_ref):
    """One batch tile.  Everything is (features, batch): batch on the lane axis."""
    x = qT_ref[...]                                                    # (in,  TB)

    h = jnp.dot(w1_ref[...], x, preferred_element_type=jnp.float32) + b1_ref[...]
    h = _softplus(h)                                                   # (H,   TB)

    h = jnp.dot(w2_ref[...], h, preferred_element_type=jnp.float32) + b2_ref[...]
    h = _softplus(h)                                                   # (H,   TB)

    d = jnp.dot(w3_ref[...], h, preferred_element_type=jnp.float32) + b3_ref[...]
    d = _softplus(d) + EPSILON                                         # (2,   TB)

    outT_ref[...] = d.astype(outT_ref.dtype)


def kinetic_diag_entries(q, params, tile_b=512):
    """q: (B, input_size) f32 -> (B, 2) = softplus(network(q)) + epsilon.

    These are the diagonal entries of the kinetic matrix for each row of q.
    """
    B, in_sz = q.shape
    hid = params["w1"].shape[0]
    out_sz = params["w3"].shape[0]

    # Batch tile: multiple of 128 (batch is the lane axis in-kernel); don't
    # over-pad tiny batches.
    tile_b = max(128, pl.cdiv(int(tile_b), 128) * 128)
    tile_b = min(tile_b, pl.cdiv(B, 128) * 128)
    b_pad = pl.cdiv(B, tile_b) * tile_b
    num_tiles = b_pad // tile_b

    # Layout plumbing only: present q transposed + zero-padded so kernel I/O is
    # lane-dense.  Padded columns compute harmless finite values and are sliced off.
    qT = q.T
    if b_pad != B:
        qT = jnp.pad(qT, ((0, 0), (0, b_pad - B)))

    flops = 2 * b_pad * (in_sz * hid + hid * hid + hid * out_sz)
    transcendentals = 2 * b_pad * (hid + hid + out_sz)          # exp + log per softplus
    bytes_accessed = 4 * (in_sz * b_pad + out_sz * b_pad
                          + sum(int(params[k].size)
                                for k in ("w1", "b1", "w2", "b2", "w3", "b3")))

    out_T = pl.pallas_call(
        _kinetic_mlp_kernel,
        out_shape=jax.ShapeDtypeStruct((out_sz, b_pad), jnp.float32),
        grid=(num_tiles,),
        in_specs=[
            # q tiles stream through the pipeline (lane-dense along batch).
            pl.BlockSpec((in_sz, tile_b), lambda i: (0, i)),
            # Weights / biases: constant index_map -> stay VMEM-resident.
            pl.BlockSpec((hid, in_sz), lambda i: (0, 0)),
            pl.BlockSpec((hid, 1), lambda i: (0, 0)),
            pl.BlockSpec((hid, hid), lambda i: (0, 0)),
            pl.BlockSpec((hid, 1), lambda i: (0, 0)),
            pl.BlockSpec((out_sz, hid), lambda i: (0, 0)),
            pl.BlockSpec((out_sz, 1), lambda i: (0, 0)),
        ],
        out_specs=pl.BlockSpec((out_sz, tile_b), lambda i: (0, i)),
        compiler_params=pltpu.CompilerParams(
            dimension_semantics=("parallel",)),
        cost_estimate=pl.CostEstimate(flops=int(flops),
                                      transcendentals=int(transcendentals),
                                      bytes_accessed=int(bytes_accessed)),
    )(qT,
      params["w1"], params["b1"],
      params["w2"], params["b2"],
      params["w3"], params["b3"])

    return out_T[:, :B].T                                       # (B, 2)


def kinetic_matrix_nn_forward(q, params):
    """Faithful to Kinetic_Matrix_NN.forward: q is one (input_size,) state.

    Returns the (2, 2) diagonal kinetic matrix diag(softplus(network(q)) + eps).
    """
    d = kinetic_diag_entries(q[None, :], params)[0]             # (2,)
    # torch.diag equivalent: trivial 2x2 construction, done in the wrapper.
    return jnp.diag(d)


def init_params(key, input_size, hidden_size, out_size=2):
    """nn.Linear-style init; weights kept in torch (out, in) orientation."""
    def linear(k, fan_in, fan_out):
        kw, kb = jax.random.split(k)
        bound = 1.0 / jnp.sqrt(fan_in)
        w = jax.random.uniform(kw, (fan_out, fan_in), jnp.float32, -bound, bound)
        b = jax.random.uniform(kb, (fan_out, 1), jnp.float32, -bound, bound)
        return w, b

    keys = jax.random.split(key, 3)
    w1, b1 = linear(keys[0], input_size, hidden_size)
    w2, b2 = linear(keys[1], hidden_size, hidden_size)
    w3, b3 = linear(keys[2], hidden_size, out_size)
    return {"w1": w1, "b1": b1, "w2": w2, "b2": b2, "w3": w3, "b3": b3,
            # constants of the module; unused in forward()
            "m": jnp.float32(5.0), "L": jnp.float32(1.0)}


def _reference_network(q, p):
    """Pure-JAX reference of self.network(q) + epsilon for q of shape (B, in)."""
    h = _softplus(q @ p["w1"].T + p["b1"][:, 0])
    h = _softplus(h @ p["w2"].T + p["b2"][:, 0])
    return _softplus(h @ p["w3"].T + p["b3"][:, 0]) + EPSILON


if __name__ == "__main__":
    key = jax.random.PRNGKey(0)
    k_param, k_q, k_batch = jax.random.split(key, 3)

    input_size = 16
    hidden_size = 32
    params = init_params(k_param, input_size, hidden_size)

    # 1) Module-faithful forward: single q -> (2, 2) diagonal kinetic matrix.
    q = jax.random.normal(k_q, (input_size,), dtype=jnp.float32)
    K = jax.block_until_ready(kinetic_matrix_nn_forward(q, params))
    K_ref = jnp.diag(_reference_network(q[None, :], params)[0])
    assert K.shape == (2, 2), K.shape
    assert jnp.allclose(K, K_ref, atol=1e-4, rtol=1e-4), "single-q mismatch"

    # 2) Batched diagonal-entry path, small tile to exercise the multi-step grid
    #    (300 rows -> 3 tiles of 128 with padding).
    qb = jax.random.normal(k_batch, (300, input_size), dtype=jnp.float32)
    db = jax.block_until_ready(kinetic_diag_entries(qb, params, tile_b=128))
    db_ref = _reference_network(qb, params)
    assert db.shape == (300, 2), db.shape
    assert jnp.allclose(db, db_ref, atol=1e-4, rtol=1e-4), "batched mismatch"

    print("KERNEL_OK")
</pallas_src>

<mosaic_0001>
module attributes {stable_mosaic.version = 11 : i64} {
  func.func @_kinetic_mlp_kernel(%arg0: i32, %arg1: memref<16x128xf32, #tpu.memory_space<vmem>>, %arg2: memref<32x16xf32, #tpu.memory_space<vmem>>, %arg3: memref<32x1xf32, #tpu.memory_space<vmem>>, %arg4: memref<32x32xf32, #tpu.memory_space<vmem>>, %arg5: memref<32x1xf32, #tpu.memory_space<vmem>>, %arg6: memref<2x32xf32, #tpu.memory_space<vmem>>, %arg7: memref<2x1xf32, #tpu.memory_space<vmem>>, %arg8: memref<2x128xf32, #tpu.memory_space<vmem>>) attributes {dimension_semantics = [#tpu.dimension_semantics<parallel>], iteration_bounds = array<i64: 1>, scalar_prefetch = 0 : i64, scratch_operands = 0 : i64, tpu.core_type = #tpu.core_type<tc>, window_params = [{transform_indices = @transform_0, window_bounds = array<i64: 16, 128>}, {pipeline_mode = #tpu.pipeline_mode<synchronous>, transform_indices = @transform_1, window_bounds = array<i64: 32, 16>}, {pipeline_mode = #tpu.pipeline_mode<synchronous>, transform_indices = @transform_2, window_bounds = array<i64: 32, 1>}, {pipeline_mode = #tpu.pipeline_mode<synchronous>, transform_indices = @transform_3, window_bounds = array<i64: 32, 32>}, {pipeline_mode = #tpu.pipeline_mode<synchronous>, transform_indices = @transform_4, window_bounds = array<i64: 32, 1>}, {pipeline_mode = #tpu.pipeline_mode<synchronous>, transform_indices = @transform_5, window_bounds = array<i64: 2, 32>}, {pipeline_mode = #tpu.pipeline_mode<synchronous>, transform_indices = @transform_6, window_bounds = array<i64: 2, 1>}, {transform_indices = @transform_7, window_bounds = array<i64: 2, 128>}]} {
    %c0 = arith.constant 0 : index
    %c0_0 = arith.constant 0 : index
    %0 = vector.load %arg1[%c0, %c0_0] : memref<16x128xf32, #tpu.memory_space<vmem>>, vector<16x128xf32>
    %c0_1 = arith.constant 0 : index
    %c0_2 = arith.constant 0 : index
    %1 = vector.load %arg2[%c0_1, %c0_2] : memref<32x16xf32, #tpu.memory_space<vmem>>, vector<32x16xf32>
    %cst = arith.constant dense<0.000000e+00> : vector<32x128xf32>
    %2 = tpu.matmul %1, %0, %cst {dimension_numbers = #tpu.dot_dimension_numbers<[1], [0], [0], [1], [0, 0, 1, 1], [], []>} : vector<32x16xf32>, vector<16x128xf32>, vector<32x128xf32> -> vector<32x128xf32>
    %c0_3 = arith.constant 0 : index
    %c0_4 = arith.constant 0 : index
    %3 = vector.load %arg3[%c0_3, %c0_4] : memref<32x1xf32, #tpu.memory_space<vmem>>, vector<32x1xf32>
    %4 = vector.broadcast %3 : vector<32x1xf32> to vector<32x128xf32>
    %5 = arith.addf %2, %4 : vector<32x128xf32>
    %cst_5 = arith.constant 0.000000e+00 : f32
    %6 = vector.broadcast %cst_5 : f32 to vector<32x128xf32>
    %7 = arith.maximumf %5, %6 : vector<32x128xf32>
    %8 = math.absf %5 : vector<32x128xf32>
    %cst_6 = arith.constant 0.000000e+00 : f32
    %9 = vector.broadcast %cst_6 : f32 to vector<32x128xf32>
    %10 = arith.subf %9, %8 : vector<32x128xf32>
    %11 = math.exp %10 : vector<32x128xf32>
    %cst_7 = arith.constant 1.000000e+00 : f32
    %12 = vector.broadcast %cst_7 : f32 to vector<32x128xf32>
    %13 = arith.addf %12, %11 : vector<32x128xf32>
    %14 = math.log %13 : vector<32x128xf32>
    %15 = arith.addf %7, %14 : vector<32x128xf32>
    %c0_8 = arith.constant 0 : index
    %c0_9 = arith.constant 0 : index
    %16 = vector.load %arg4[%c0_8, %c0_9] : memref<32x32xf32, #tpu.memory_space<vmem>>, vector<32x32xf32>
    %cst_10 = arith.constant dense<0.000000e+00> : vector<32x128xf32>
    %17 = tpu.matmul %16, %15, %cst_10 {dimension_numbers = #tpu.dot_dimension_numbers<[1], [0], [0], [1], [0, 0, 1, 1], [], []>} : vector<32x32xf32>, vector<32x128xf32>, vector<32x128xf32> -> vector<32x128xf32>
    %c0_11 = arith.constant 0 : index
    %c0_12 = arith.constant 0 : index
    %18 = vector.load %arg5[%c0_11, %c0_12] : memref<32x1xf32, #tpu.memory_space<vmem>>, vector<32x1xf32>
    %19 = vector.broadcast %18 : vector<32x1xf32> to vector<32x128xf32>
    %20 = arith.addf %17, %19 : vector<32x128xf32>
    %cst_13 = arith.constant 0.000000e+00 : f32
    %21 = vector.broadcast %cst_13 : f32 to vector<32x128xf32>
    %22 = arith.maximumf %20, %21 : vector<32x128xf32>
    %23 = math.absf %20 : vector<32x128xf32>
    %cst_14 = arith.constant 0.000000e+00 : f32
    %24 = vector.broadcast %cst_14 : f32 to vector<32x128xf32>
    %25 = arith.subf %24, %23 : vector<32x128xf32>
    %26 = math.exp %25 : vector<32x128xf32>
    %cst_15 = arith.constant 1.000000e+00 : f32
    %27 = vector.broadcast %cst_15 : f32 to vector<32x128xf32>
    %28 = arith.addf %27, %26 : vector<32x128xf32>
    %29 = math.log %28 : vector<32x128xf32>
    %30 = arith.addf %22, %29 : vector<32x128xf32>
    %c0_16 = arith.constant 0 : index
    %c0_17 = arith.constant 0 : index
    %31 = vector.load %arg6[%c0_16, %c0_17] : memref<2x32xf32, #tpu.memory_space<vmem>>, vector<2x32xf32>
    %cst_18 = arith.constant dense<0.000000e+00> : vector<2x128xf32>
    %32 = tpu.matmul %31, %30, %cst_18 {dimension_numbers = #tpu.dot_dimension_numbers<[1], [0], [0], [1], [0, 0, 1, 1], [], []>} : vector<2x32xf32>, vector<32x128xf32>, vector<2x128xf32> -> vector<2x128xf32>
    %c0_19 = arith.constant 0 : index
    %c0_20 = arith.constant 0 : index
    %33 = vector.load %arg7[%c0_19, %c0_20] : memref<2x1xf32, #tpu.memory_space<vmem>>, vector<2x1xf32>
    %34 = vector.broadcast %33 : vector<2x1xf32> to vector<2x128xf32>
    %35 = arith.addf %32, %34 : vector<2x128xf32>
    %cst_21 = arith.constant 0.000000e+00 : f32
    %36 = vector.broadcast %cst_21 : f32 to vector<2x128xf32>
    %37 = arith.maximumf %35, %36 : vector<2x128xf32>
    %38 = math.absf %35 : vector<2x128xf32>
    %cst_22 = arith.constant 0.000000e+00 : f32
    %39 = vector.broadcast %cst_22 : f32 to vector<2x128xf32>
    %40 = arith.subf %39, %38 : vector<2x128xf32>
    %41 = math.exp %40 : vector<2x128xf32>
    %cst_23 = arith.constant 1.000000e+00 : f32
    %42 = vector.broadcast %cst_23 : f32 to vector<2x128xf32>
    %43 = arith.addf %42, %41 : vector<2x128xf32>
    %44 = math.log %43 : vector<2x128xf32>
    %45 = arith.addf %37, %44 : vector<2x128xf32>
    %cst_24 = arith.constant 2.000000e-03 : f32
    %46 = vector.broadcast %cst_24 : f32 to vector<2x128xf32>
    %47 = arith.addf %45, %46 : vector<2x128xf32>
    %c0_25 = arith.constant 0 : index
    %c0_26 = arith.constant 0 : index
    %48 = vector.load %arg8[%c0_25, %c0_26] : memref<2x128xf32, #tpu.memory_space<vmem>>, vector<2x128xf32>
    tpu.vector_store %arg8[%c0_25, %c0_26], %47 {strides = array<i32>} : memref<2x128xf32, #tpu.memory_space<vmem>>, vector<2x128xf32>,
    return
  }
  func.func @transform_0(%arg0: i32) -> (i32, i32) {
    %c0_i32 = arith.constant 0 : i32
    %c0_i32_0 = arith.constant 0 : i32
    return %c0_i32, %arg0 : i32, i32
  }
  func.func @transform_1(%arg0: i32) -> (i32, i32) {
    %c0_i32 = arith.constant 0 : i32
    %c0_i32_0 = arith.constant 0 : i32
    %c0_i32_1 = arith.constant 0 : i32
    return %c0_i32, %c0_i32_0 : i32, i32
  }
  func.func @transform_2(%arg0: i32) -> (i32, i32) {
    %c0_i32 = arith.constant 0 : i32
    %c0_i32_0 = arith.constant 0 : i32
    %c0_i32_1 = arith.constant 0 : i32
    return %c0_i32, %c0_i32_0 : i32, i32
  }
  func.func @transform_3(%arg0: i32) -> (i32, i32) {
    %c0_i32 = arith.constant 0 : i32
    %c0_i32_0 = arith.constant 0 : i32
    %c0_i32_1 = arith.constant 0 : i32
    return %c0_i32, %c0_i32_0 : i32, i32
  }
  func.func @transform_4(%arg0: i32) -> (i32, i32) {
    %c0_i32 = arith.constant 0 : i32
    %c0_i32_0 = arith.constant 0 : i32
    %c0_i32_1 = arith.constant 0 : i32
    return %c0_i32, %c0_i32_0 : i32, i32
  }
  func.func @transform_5(%arg0: i32) -> (i32, i32) {
    %c0_i32 = arith.constant 0 : i32
    %c0_i32_0 = arith.constant 0 : i32
    %c0_i32_1 = arith.constant 0 : i32
    return %c0_i32, %c0_i32_0 : i32, i32
  }
  func.func @transform_6(%arg0: i32) -> (i32, i32) {
    %c0_i32 = arith.constant 0 : i32
    %c0_i32_0 = arith.constant 0 : i32
    %c0_i32_1 = arith.constant 0 : i32
    return %c0_i32, %c0_i32_0 : i32, i32
  }
  func.func @transform_7(%arg0: i32) -> (i32, i32) {
    %c0_i32 = arith.constant 0 : i32
    %c0_i32_0 = arith.constant 0 : i32
    return %c0_i32, %arg0 : i32, i32
  }
}

</mosaic_0001>

<bundles_post_ra>
// kernel: tpu_custom_call.1
= control target key start
LH: loop header
LB: loop body
LE: loop exit
PB: predicated region body
PF: predicated region fallthrough
CT: control target
= control target key end

     0   :  { %vm57_vm0 = vcmask 130048   ;;  %v384_v4 = vmov 0   ;;  %s502_s0 = inlined_call_operand.vmem [shape: f32[16,128], index: 0, kind: input, shape index: {}]   ;;  %s503_s1 = inlined_call_operand.vmem [shape: f32[32,16], index: 1, kind: input, shape index: {}]   ;;  %s504_s2 = inlined_call_operand.vmem [shape: f32[32,1], index: 2, kind: input, shape index: {}]   ;;  %s505_s3 = inlined_call_operand.vmem [shape: f32[32,32], index: 3, kind: input, shape index: {}]   ;;  %s506_s4 = inlined_call_operand.vmem [shape: f32[32,1], index: 4, kind: input, shape index: {}]   ;;  %s507_s5 = inlined_call_operand.vmem [shape: f32[2,32], index: 5, kind: input, shape index: {}]   ;;  %s508_s6 = inlined_call_operand.vmem [shape: f32[2,1], index: 6, kind: input, shape index: {}]   ;;  %s509_s7 = inlined_call_operand.hbm [shape: f32[2,128], index: 7, kind: output, shape index: {}]  }
   0x1   :  { %v28_v0 = vld [vmem:[%s502_s0 + $0x8] sm:$0xff]  ;;  %v27_v1 = vld [vmem:[%s502_s0] sm:$0xff]  ;;  %v32_v3 = vld [vmem:[%s503_s1 + $0x18] sm:$0xff]  ;;  %320 = vset.pattern.permute.xlu1 %v384_v4  ;;  %319 = vset.pattern.permute.xlu0 %v384_v4 }
   0x2   :  { %84 = vmatpush.msra.mxu0 %v28_v0  ;;  %307 = vmatpush.msra.mxu1 %v28_v0  ;;  %v29_v2 = vld [vmem:[%s503_s1] sm:$0xff]  ;;  %v36_v5 = vld [vmem:[%s504_s2 + $0x18] sm:$0xff]  ;;  %v34_v6 = vld [vmem:[%s504_s2 + $0x8] sm:$0xff] }
   0x4   :  { %85 = vmatpush.msra.mxu0 %v27_v1  ;;  %308 = vmatpush.msra.mxu1 %v27_v1 }
   0x5   :  { %298 = vmatmul.msk.f32.vlgmr.msra.gmra.mxu0 %vm57_vm0, %v29_v2  ;;  %301 = vmatmul.msk.f32.vlgmr.msra.gmra.mxu1 %vm57_vm0, %v32_v3 }
   0x6   :  { %12 = vsyncpa [#allocation3], 0  ;;  %54 = vperm.xlu0 %319, %v36_v5   ;;  %44 = vperm.xlu1 %320, %v34_v6   ;;  %v30_v7 = vld [vmem:[%s503_s1 + $0x8] sm:$0xff]  ;;  %v35_v8 = vld [vmem:[%s504_s2 + $0x10] sm:$0xff]  ;;  %vm163_vm1 = vcmask 261120   ;;  %s385_s0 = smov [#allocation2]  }
   0x7   :  { %321 = vset.pattern.permute.xlu2 %v384_v4  ;;  %v33_v9 = vld [vmem:[%s504_s2] sm:$0xff]  ;;  %v31_v10 = vld [vmem:[%s503_s1 + $0x10] sm:$0xff]  ;;  %v140_v11 = vld [vmem:[%s506_s4 + $0x8] sm:$0xff]  ;;  %s287_s12 = sshll.u32 %s385_s0, 4  ;;  %s289_s14 = sshll.u32 %s509_s7, 4  ;;  %s288_s12 = int_to_ptr.vmem [resolvable:$true] %s287_s12  ;;  %s290_s14 = int_to_ptr.hbm [resolvable:$true] %s289_s14 }
   0x8   :  { %v139_v12 = vld [vmem:[%s506_s4] sm:$0xff]  ;;  %v142_v44 = vld [vmem:[%s506_s4 + $0x18] sm:$0xff]  ;;  %v141_v50 = vld [vmem:[%s506_s4 + $0x10] sm:$0xff] }
   0x9   :  { %160 = vperm.xlu2 %321, %v142_v44   ;;  %v242_v57 = vld [vmem:[%s508_s6] sm:$0x3]  ;;  %v136_v1 = vld [vmem:[%s505_s3 + $0x8] sm:$0xff]  ;;  %v137_v2 = vld [vmem:[%s505_s3 + $0x10] sm:$0xff] }
   0xa   :  { %v135_v0 = vld [vmem:[%s505_s3] sm:$0xff]  ;;  %v138_v3 = vld [vmem:[%s505_s3 + $0x18] sm:$0xff] }
   0xd   :  { %299 = vmatmul.msk.f32.gmra.mxu0 %vm57_vm0, %v30_v7 }
   0xe   :  { %49 = vperm.xlu0 %319, %v35_v8   ;;  %39 = vperm.xlu1 %320, %v33_v9  }
  0x11   :  { %155 = vperm.xlu2 %321, %v141_v50  }
  0x15   :  { %300 = vmatmul.msk.f32.gmra.mxu0 %vm57_vm0, %v31_v10 }
  0x16   :  { %150 = vperm.xlu0 %319, %v140_v11   ;;  %145 = vperm.xlu1 %320, %v139_v12  }
  0x19   :  { %245 = vperm.xlu2 %321, %v242_v57  }
  0x63   :  { %v161_v4 = vpop.permute.xlu2 %160 }
  0x6b   :  { %v156_v8 = vpop.permute.xlu2 %155 }
  0x78   :  { %v45_v13 = vpop.permute.xlu1 %44  ;;  %v55_v14 = vpop.permute.xlu0 %54 }
  0x80   :  { %v40_v17 = vpop.permute.xlu1 %39  ;;  %v50_v31 = vpop.permute.xlu0 %49 }
  0x82   :  { %v87_v15 = vpop.f32.mrf.mxu0  ;;  %v96_v16 = vpop.f32.mrf.mxu1 }
  0x83   :  { %v97_v18 = vadd.f32 %v96_v16, %v55_v14  ;;  %v466_v20 = vadd.f32 %v87_v15, %v40_v17 }
  0x85   :  { %v106_v19 = vand.u32 2147483647, %v97_v18  ;;  %v103_v23 = vand.u32 2147483647, %v466_v20  ;;  %v102_v42 = vmax.f32 %v97_v18, 0.0  ;;  %v99_v61 = vmax.f32 %v466_v20, 0.0 }
  0x87   :  { %v110_v21 = vsub.f32 0.0, %v106_v19  ;;  %v107_v27 = vsub.f32 0.0, %v103_v23 }
  0x88   :  { %v146_v6 = vpop.permute.xlu1 %145  ;;  %v151_v7 = vpop.permute.xlu0 %150 }
  0x89   :  { %v117_v22 = vmul.f32 1.442695, %v110_v21  ;;  %v111_v32 = vmul.f32 1.442695, %v107_v27 }
  0x8a   :  { %v90_v24 = vpop.f32.mrf.mxu0 }
  0x8b   :  { %v91_v25 = vadd.f32 %v90_v24, %v45_v13  ;;  %322 = vpow2.f32 %v117_v22 }
  0x8d   :  { %v104_v26 = vand.u32 2147483647, %v91_v25  ;;  %v100_v58 = vmax.f32 %v91_v25, 0.0 }
  0x8f   :  { %v108_v28 = vsub.f32 0.0, %v104_v26 }
  0x91   :  { %v113_v29 = vmul.f32 1.442695, %v108_v28  ;;  %v323_v30 = vpop.eup %322 }
  0x92   :  { %v93_v33 = vpop.f32.mrf.mxu0  ;;  %v122_v34 = vadd.f32 1.0, %v323_v30 }
  0x93   :  { %v94_v35 = vadd.f32 %v93_v33, %v50_v31  ;;  %324 = vpow2.f32 %v113_v29 }
  0x94   :  { %326 = vlog2.f32 %v122_v34 }
  0x95   :  { %v105_v36 = vand.u32 2147483647, %v94_v35  ;;  %328 = vpow2.f32 %v111_v32  ;;  %v101_v54 = vmax.f32 %v94_v35, 0.0 }
  0x97   :  { %v109_v37 = vsub.f32 0.0, %v105_v36 }
  0x99   :  { %v115_v38 = vmul.f32 1.442695, %v109_v37  ;;  %v325_v39 = vpop.eup %324 }
  0x9a   :  { %v327_v40 = vpop.eup %326  ;;  %v120_v45 = vadd.f32 1.0, %v325_v39 }
  0x9b   :  { %330 = vpow2.f32 %v115_v38  ;;  %v329_v41 = vpop.eup %328  ;;  %v130_v43 = vmul.f32 0.6931472, %v327_v40 }
  0x9c   :  { %v119_v47 = vadd.f32 1.0, %v329_v41  ;;  %332 = vlog2.f32 %v120_v45 }
  0x9d   :  { %v134_v46 = vadd.f32 %v130_v43, %v102_v42 }
  0x9e   :  { %334 = vlog2.f32 %v119_v47 }
  0x9f   :  { %188 = vmatpush.msrb.mxu1 %v134_v46  ;;  %309 = vmatpush.msra.mxu2 %v134_v46 }
  0xa0   :  { %310 = vmatpush.msra.mxu3 %v134_v46 }
  0xa1   :  { %v331_v48 = vpop.eup %330 }
  0xa2   :  { %v121_v49 = vadd.f32 1.0, %v331_v48  ;;  %v333_v51 = vpop.eup %332 }
  0xa3   :  { %v126_v56 = vmul.f32 0.6931472, %v333_v51 }
  0xa4   :  { %336 = vlog2.f32 %v121_v49  ;;  %v335_v52 = vpop.eup %334 }
  0xa5   :  { %v124_v60 = vmul.f32 0.6931472, %v335_v52  ;;  %v132_v62 = vadd.f32 %v126_v56, %v100_v58  ;;  %v241_v52 = vld [vmem:[%s507_s5] sm:$0x3] }
  0xa7   :  { %v131_v63 = vadd.f32 %v124_v60, %v99_v61 }
  0xaa   :  { %v337_v53 = vpop.eup %336 }
  0xab   :  { %v128_v55 = vmul.f32 0.6931472, %v337_v53  ;;  %v246_v53 = vpop.permute.xlu2 %245 }
  0xad   :  { %v133_v59 = vadd.f32 %v128_v55, %v101_v54 }
  0xaf   :  { %189 = vmatpush.msrb.mxu1 %v133_v59  ;;  %311 = vmatpush.msra.mxu2 %v133_v59 }
  0xb0   :  { %312 = vmatpush.msra.mxu3 %v133_v59 }
  0xb1   :  { %190 = vmatpush.msrb.mxu1 %v132_v62  ;;  %313 = vmatpush.msra.mxu2 %v132_v62 }
  0xb2   :  { %314 = vmatpush.msra.mxu3 %v132_v62 }
  0xb3   :  { %191 = vmatpush.msrb.mxu1 %v131_v63  ;;  %315 = vmatpush.msra.mxu2 %v131_v63 }
  0xb4   :  { %316 = vmatpush.msra.mxu3 %v131_v63  ;;  %302 = vmatmul.msk.f32.vlgmr.msrb.gmra.mxu1 %vm163_vm1, %v135_v0 }
  0xb5   :  { %303 = vmatmul.msk.f32.vlgmr.msra.gmra.mxu2 %vm163_vm1, %v136_v1  ;;  %304 = vmatmul.msk.f32.vlgmr.msra.gmra.mxu3 %vm163_vm1, %v137_v2 }
  0xbd   :  { %305 = vmatmul.msk.f32.gmra.mxu3 %vm163_vm1, %v138_v3 }
 0x131   :  { %v193_v5 = vpop.f32.mrf.mxu1 }
 0x132   :  { %v194_v9 = vadd.f32 %v193_v5, %v146_v6 }
 0x134   :  { %v209_v14 = vand.u32 2147483647, %v194_v9  ;;  %v205_v49 = vmax.f32 %v194_v9, 0.0 }
 0x136   :  { %v213_v19 = vsub.f32 0.0, %v209_v14 }
 0x138   :  { %v196_v10 = vpop.f32.mrf.mxu2  ;;  %v199_v11 = vpop.f32.mrf.mxu3  ;;  %v217_v24 = vmul.f32 1.442695, %v213_v19 }
 0x139   :  { %v197_v12 = vadd.f32 %v196_v10, %v151_v7  ;;  %v200_v13 = vadd.f32 %v199_v11, %v156_v8 }
 0x13b   :  { %v210_v15 = vand.u32 2147483647, %v197_v12  ;;  %v211_v16 = vand.u32 2147483647, %v200_v13  ;;  %v207_v43 = vmax.f32 %v200_v13, 0.0  ;;  %v206_v46 = vmax.f32 %v197_v12, 0.0 }
 0x13d   :  { %v214_v17 = vsub.f32 0.0, %v210_v15  ;;  %v215_v18 = vsub.f32 0.0, %v211_v16 }
 0x13f   :  { %v221_v20 = vmul.f32 1.442695, %v215_v18  ;;  %v219_v21 = vmul.f32 1.442695, %v214_v17 }
 0x140   :  { %v202_v22 = vpop.f32.mrf.mxu3 }
 0x141   :  { %v203_v23 = vadd.f32 %v202_v22, %v161_v4  ;;  %338 = vpow2.f32 %v221_v20 }
 0x142   :  { %340 = vpow2.f32 %v219_v21 }
 0x143   :  { %v212_v25 = vand.u32 2147483647, %v203_v23  ;;  %342 = vpow2.f32 %v217_v24  ;;  %v208_v39 = vmax.f32 %v203_v23, 0.0 }
 0x145   :  { %v216_v26 = vsub.f32 0.0, %v212_v25 }
 0x147   :  { %v223_v27 = vmul.f32 1.442695, %v216_v26  ;;  %v339_v28 = vpop.eup %338 }
 0x148   :  { %v341_v29 = vpop.eup %340  ;;  %v227_v30 = vadd.f32 1.0, %v339_v28 }
 0x149   :  { %344 = vpow2.f32 %v223_v27  ;;  %v343_v31 = vpop.eup %342  ;;  %v226_v32 = vadd.f32 1.0, %v341_v29 }
 0x14a   :  { %346 = vlog2.f32 %v227_v30  ;;  %v225_v35 = vadd.f32 1.0, %v343_v31 }
 0x14b   :  { %348 = vlog2.f32 %v226_v32 }
 0x14f   :  { %v345_v33 = vpop.eup %344 }
 0x150   :  { %v228_v34 = vadd.f32 1.0, %v345_v33  ;;  %v347_v36 = vpop.eup %346 }
 0x151   :  { %v349_v37 = vpop.eup %348  ;;  %v234_v41 = vmul.f32 0.6931472, %v347_v36 }
 0x152   :  { %350 = vlog2.f32 %v228_v34  ;;  %v232_v45 = vmul.f32 0.6931472, %v349_v37 }
 0x153   :  { %352 = vlog2.f32 %v225_v35  ;;  %v239_v47 = vadd.f32 %v234_v41, %v207_v43 }
 0x154   :  { %v238_v50 = vadd.f32 %v232_v45, %v206_v46 }
 0x158   :  { %v351_v38 = vpop.eup %350 }
 0x159   :  { %v236_v40 = vmul.f32 0.6931472, %v351_v38  ;;  %v353_v42 = vpop.eup %352 }
 0x15a   :  { %v230_v48 = vmul.f32 0.6931472, %v353_v42 }
 0x15b   :  { %v240_v44 = vadd.f32 %v236_v40, %v208_v39 }
 0x15c   :  { %v237_v51 = vadd.f32 %v230_v48, %v205_v49 }
 0x15d   :  { %263 = vmatpush.msrb.mxu2 %v240_v44 }
 0x15f   :  { %264 = vmatpush.msrb.mxu2 %v239_v47 }
 0x161   :  { %265 = vmatpush.msrb.mxu2 %v238_v50 }
 0x163   :  { %266 = vmatpush.msrb.mxu2 %v237_v51 }
 0x164   :  { %306 = vmatmul.msk.f32.vlgmr.msrb.gmra.mxu2 %vm163_vm1, %v241_v52 }
 0x1e7   :  { %v268_v54 = vpop.f32.mrf.mxu2 }
 0x1e8   :  { %v269_v55 = vadd.f32 %v268_v54, %v246_v53 }
 0x1ea   :  { %v272_v56 = vand.u32 2147483647, %v269_v55  ;;  %v271_v62 = vmax.f32 %v269_v55, 0.0 }
 0x1ec   :  { %v273_v57 = vsub.f32 0.0, %v272_v56 }
 0x1ee   :  { %v274_v58 = vmul.f32 1.442695, %v273_v57 }
 0x1f0   :  { %354 = vpow2.f32 %v274_v58 }
 0x1f6   :  { %v355_v59 = vpop.eup %354 }
 0x1f7   :  { %v276_v60 = vadd.f32 1.0, %v355_v59 }
 0x1f9   :  { %356 = vlog2.f32 %v276_v60 }
 0x1ff   :  { %v357_v61 = vpop.eup %356 }
 0x200   :  { %v278_v63 = vmul.f32 0.6931472, %v357_v61 }
 0x202   :  { %v279_v0 = vadd.f32 %v278_v63, %v271_v62 }
 0x204   :  { %v280_v1 = vadd.f32 0.002, %v279_v0 }
 0x206   :  { %281 = vst [vmem:[#allocation2] sm:$0x3] %v280_v1 }
 0x207   :  { %292 = dma.vmem_to_hbm [thread:$0]  %s288_s12, 32, %s290_s14, [#allocation3]  }
 0x208   :  { %382 = dma.done.wait [#allocation3], 32  }
 0x209   :  { %383 = vsyncadd [#allocation3], 4294967264 }
 0x20a   :  { %297 = vsyncpa [#allocation3], 1 }

</bundles_post_ra>
